<compile_context>
chip_gen: v6e
topology: v6e:2x2x1
jax: 0.10.0
libtpu: 0.0.40
codegen_flags: <defaults>
</compile_context>

<pallas_src>
import jax
import jax.numpy as jnp
from jax import lax
from jax.experimental import pallas as pl
from jax.experimental.pallas import tpu as pltpu


def _round_up(x, m):
    return (x + m - 1) // m * m


def _transition_kernel(x_ref, scale_ref, shift_ref, wt_ref, up_ref, o_ref):
    """One grid step: Nb batch elements x R input rows, fully fused.

    x_ref:     (Nb, Cin, R, W)     input tile, native dtype, NCHW layout
    scale_ref: (Cin, 1)  f32       folded BN scale = gamma / sqrt(var + eps)
    shift_ref: (Cin, 1)  f32       folded BN shift = beta - mean * scale
    wt_ref:    (Cout, Cin)         transposed 1x1 ConvTranspose2d weight
    up_ref:    (W, 2W)   f32       one-hot column-duplication (nearest x2 in width)
    o_ref:     (Nb, Cout, 2R, 2W)  output tile in the FINAL upsampled layout
    """
    scale = scale_ref[...]
    shift = shift_ref[...]
    wt = wt_ref[...]
    up = up_ref[...]

    nb_blk, _, n_rows, w = x_ref.shape
    cout = o_ref.shape[1]

    for nb in range(nb_blk):                                   # static, small

        def row_body(r, carry):
            # BatchNorm (inference) + ReLU on one input row, in f32 registers.
            xr = jnp.squeeze(x_ref[nb, :, pl.ds(r, 1), :], axis=1)          # (Cin, W)
            yr = jnp.maximum(xr.astype(jnp.float32) * scale + shift, 0.0)   # (Cin, W)
            # 1x1 transposed conv == channel matmul on the MXU (native-dtype operands,
            # f32 accumulation).
            zr = jnp.dot(wt, yr.astype(wt.dtype),
                         preferred_element_type=jnp.float32)                # (Cout, W)
            # Nearest x2 along width as a tiny one-hot matmul (each output column is
            # exactly one input column, so this is numerically exact).
            ur = jnp.dot(zr, up, preferred_element_type=jnp.float32)        # (Cout, 2W)
            ur = ur.astype(o_ref.dtype)
            # Nearest x2 along height: store the row into both output rows 2r, 2r+1.
            o_ref[nb, :, pl.ds(2 * r, 2), :] = jnp.broadcast_to(
                ur[:, None, :], (cout, 2, 2 * w))
            return carry

        lax.fori_loop(0, n_rows, row_body, 0)


def _choose_tiles(N, H, W, Cin, Cout, in_bytes, out_bytes,
                  tile_budget=10 << 20, min_step_bytes=512 << 10):
    """Pick (Nb batch elements, R input rows) per grid step from a VMEM budget."""
    lane = 128
    w_in = max(_round_up(W, lane), lane)            # VMEM lane padding of input tile
    w_out = max(_round_up(2 * W, lane), lane)       # VMEM lane padding of output tile

    def step_bytes(nb, r):
        in_b = nb * Cin * _round_up(r, 8) * w_in * in_bytes
        out_b = nb * Cout * _round_up(2 * r, 8) * w_out * out_bytes
        return 2 * (in_b + out_b)                   # x2: double-buffered pipeline

    # Row-tile candidates: multiples of 8 dividing H (BlockSpec sublane rule), plus H.
    cands = sorted({d for d in range(8, H + 1, 8) if H % d == 0} | {H})
    R = cands[0]
    for r in cands:                                  # largest candidate within budget
        if step_bytes(1, r) <= tile_budget:
            R = r

    # Batch blocking: grow Nb (divisor of N) until each grid step is big enough to
    # amortize the ~0.35 us per-step overhead, staying inside the VMEM budget.
    Nb = 1
    for d in range(1, N + 1):
        if N % d:
            continue
        if step_bytes(d, R) > tile_budget:
            break
        Nb = d
        if step_bytes(d, R) >= min_step_bytes:
            break
    return Nb, R


def transition_block(x_nchw, gamma, beta, running_mean, running_var, w_io, eps=1e-5):
    """Pallas implementation of TransitionBlock.forward (eval mode, dropRate == 0)."""
    N, Cin, H, W = x_nchw.shape
    Cout = w_io.shape[1]
    out_dtype = x_nchw.dtype

    # Folded BN parameters (tiny, kept f32 for accuracy on every TPU generation).
    inv_std = 1.0 / jnp.sqrt(running_var.astype(jnp.float32) + eps)
    g32 = gamma.astype(jnp.float32)
    scale = (g32 * inv_std).reshape(Cin, 1)
    shift = (beta.astype(jnp.float32)
             - running_mean.astype(jnp.float32) * g32 * inv_std).reshape(Cin, 1)
    # Transposed 1x1 ConvTranspose2d weight in the activation dtype (bf16 -> bf16 MXU).
    wt = jnp.transpose(w_io).astype(out_dtype)                          # (Cout, Cin)
    # One-hot column-duplication matrix: up[c, 2c] = up[c, 2c + 1] = 1.
    up = (jnp.arange(2 * W)[None, :] // 2 == jnp.arange(W)[:, None]).astype(jnp.float32)

    Nb, R = _choose_tiles(N, H, W, Cin, Cout,
                          x_nchw.dtype.itemsize, jnp.dtype(out_dtype).itemsize)

    out = pl.pallas_call(
        _transition_kernel,
        out_shape=jax.ShapeDtypeStruct((N, Cout, 2 * H, 2 * W), out_dtype),
        grid=(N // Nb, H // R),
        in_specs=[
            pl.BlockSpec((Nb, Cin, R, W), lambda b, s: (b, 0, s, 0)),
            pl.BlockSpec((Cin, 1), lambda b, s: (0, 0)),
            pl.BlockSpec((Cin, 1), lambda b, s: (0, 0)),
            pl.BlockSpec((Cout, Cin), lambda b, s: (0, 0)),
            pl.BlockSpec((W, 2 * W), lambda b, s: (0, 0)),
        ],
        out_specs=pl.BlockSpec((Nb, Cout, 2 * R, 2 * W), lambda b, s: (b, 0, s, 0)),
        compiler_params=pltpu.CompilerParams(
            dimension_semantics=("parallel", "parallel"),
            vmem_limit_bytes=32 << 20),
    )(x_nchw, scale, shift, wt, up)
    return out


def _reference(x_nchw, gamma, beta, running_mean, running_var, w_io, eps=1e-5):
    """Pure-JAX reference mirroring the PyTorch forward (eval mode)."""
    xn = (x_nchw - running_mean[None, :, None, None]) / jnp.sqrt(
        running_var[None, :, None, None] + eps)
    xn = xn * gamma[None, :, None, None] + beta[None, :, None, None]
    xn = jnp.maximum(xn, 0.0)
    out = jnp.einsum('nihw,io->nohw', xn, w_io)                # 1x1 ConvTranspose2d, no bias
    out = jnp.repeat(jnp.repeat(out, 2, axis=2), 2, axis=3)    # F.upsample_nearest x2
    return out


if __name__ == "__main__":
    # Small shapes consistent with the module: TransitionBlock(in_planes=4, out_planes=8)
    N, Cin, H, W = 2, 4, 16, 16
    Cout = 8

    key = jax.random.PRNGKey(0)
    kx, kg, kb, km, kv, kw = jax.random.split(key, 6)

    x = jax.random.normal(kx, (N, Cin, H, W), dtype=jnp.float32)

    # Deterministic synthetic parameters (BatchNorm2d + ConvTranspose2d weight).
    gamma = 1.0 + 0.1 * jax.random.normal(kg, (Cin,), dtype=jnp.float32)
    beta = 0.1 * jax.random.normal(kb, (Cin,), dtype=jnp.float32)
    running_mean = 0.1 * jax.random.normal(km, (Cin,), dtype=jnp.float32)
    running_var = jnp.abs(jax.random.normal(kv, (Cin,), dtype=jnp.float32)) + 0.5
    w_io = 0.1 * jax.random.normal(kw, (Cin, Cout), dtype=jnp.float32)  # (in, out, 1, 1) squeezed

    out = transition_block(x, gamma, beta, running_mean, running_var, w_io)
    out = jax.block_until_ready(out)

    ref = _reference(x, gamma, beta, running_mean, running_var, w_io)
    assert out.shape == (N, Cout, 2 * H, 2 * W), out.shape
    assert out.dtype == x.dtype, out.dtype
    assert jnp.allclose(out, ref, atol=1e-4, rtol=1e-4), float(jnp.max(jnp.abs(out - ref)))

    print("KERNEL_OK")
</pallas_src>

<mosaic_0001>
module attributes {stable_mosaic.version = 11 : i64} {
  func.func @_transition_kernel(%arg0: i32, %arg1: i32, %arg2: memref<2x4x16x16xf32, #tpu.memory_space<vmem>>, %arg3: memref<4x1xf32, #tpu.memory_space<vmem>>, %arg4: memref<4x1xf32, #tpu.memory_space<vmem>>, %arg5: memref<8x4xf32, #tpu.memory_space<vmem>>, %arg6: memref<16x32xf32, #tpu.memory_space<vmem>>, %arg7: memref<2x8x32x32xf32, #tpu.memory_space<vmem>>) attributes {dimension_semantics = [#tpu.dimension_semantics<parallel>, #tpu.dimension_semantics<parallel>], iteration_bounds = array<i64: 1, 1>, scalar_prefetch = 0 : i64, scratch_operands = 0 : i64, tpu.core_type = #tpu.core_type<tc>, window_params = [{transform_indices = @transform_0, window_bounds = array<i64: 2, 4, 16, 16>}, {pipeline_mode = #tpu.pipeline_mode<synchronous>, transform_indices = @transform_1, window_bounds = array<i64: 4, 1>}, {pipeline_mode = #tpu.pipeline_mode<synchronous>, transform_indices = @transform_2, window_bounds = array<i64: 4, 1>}, {pipeline_mode = #tpu.pipeline_mode<synchronous>, transform_indices = @transform_3, window_bounds = array<i64: 8, 4>}, {pipeline_mode = #tpu.pipeline_mode<synchronous>, transform_indices = @transform_4, window_bounds = array<i64: 16, 32>}, {transform_indices = @transform_5, window_bounds = array<i64: 2, 8, 32, 32>}]} {
    %c0 = arith.constant 0 : index
    %c0_0 = arith.constant 0 : index
    %0 = vector.load %arg3[%c0, %c0_0] : memref<4x1xf32, #tpu.memory_space<vmem>>, vector<4x1xf32>
    %c0_1 = arith.constant 0 : index
    %c0_2 = arith.constant 0 : index
    %1 = vector.load %arg4[%c0_1, %c0_2] : memref<4x1xf32, #tpu.memory_space<vmem>>, vector<4x1xf32>
    %c0_3 = arith.constant 0 : index
    %c0_4 = arith.constant 0 : index
    %2 = vector.load %arg5[%c0_3, %c0_4] : memref<8x4xf32, #tpu.memory_space<vmem>>, vector<8x4xf32>
    %c0_5 = arith.constant 0 : index
    %c0_6 = arith.constant 0 : index
    %3 = vector.load %arg6[%c0_5, %c0_6] : memref<16x32xf32, #tpu.memory_space<vmem>>, vector<16x32xf32>
    %c0_i32 = arith.constant 0 : i32
    %c16_i32 = arith.constant 16 : i32
    %4 = arith.addi %c0_i32, %c16_i32 : i32
    %c1_i32 = arith.constant 1 : i32
    scf.for %arg8 = %c0_i32 to %4 step %c1_i32  : i32 {
      %c0_12 = arith.constant 0 : index
      %c0_13 = arith.constant 0 : index
      %6 = arith.index_cast %arg8 : i32 to index
      %c0_14 = arith.constant 0 : index
      %7 = vector.load %arg2[%c0_12, %c0_13, %6, %c0_14] : memref<2x4x16x16xf32, #tpu.memory_space<vmem>>, vector<1x4x1x16xf32>
      %8 = vector.shape_cast %7 : vector<1x4x1x16xf32> to vector<4x1x16xf32>
      %9 = vector.shape_cast %8 : vector<4x1x16xf32> to vector<4x16xf32>
      %10 = vector.broadcast %0 : vector<4x1xf32> to vector<4x16xf32>
      %11 = arith.mulf %9, %10 : vector<4x16xf32>
      %12 = vector.broadcast %1 : vector<4x1xf32> to vector<4x16xf32>
      %13 = arith.addf %11, %12 : vector<4x16xf32>
      %cst = arith.constant 0.000000e+00 : f32
      %14 = vector.broadcast %cst : f32 to vector<4x16xf32>
      %15 = arith.maximumf %13, %14 : vector<4x16xf32>
      %cst_15 = arith.constant dense<0.000000e+00> : vector<8x16xf32>
      %16 = tpu.matmul %2, %15, %cst_15 {dimension_numbers = #tpu.dot_dimension_numbers<[1], [0], [0], [1], [0, 0, 1, 1], [], []>} : vector<8x4xf32>, vector<4x16xf32>, vector<8x16xf32> -> vector<8x16xf32>
      %cst_16 = arith.constant dense<0.000000e+00> : vector<8x32xf32>
      %17 = tpu.matmul %16, %3, %cst_16 {dimension_numbers = #tpu.dot_dimension_numbers<[1], [0], [0], [1], [0, 0, 1, 1], [], []>} : vector<8x16xf32>, vector<16x32xf32>, vector<8x32xf32> -> vector<8x32xf32>
      %18 = vector.shape_cast %17 : vector<8x32xf32> to vector<8x1x32xf32>
      %19 = vector.shape_cast %18 : vector<8x1x32xf32> to vector<8x1x32xf32>
      %20 = vector.broadcast %19 : vector<8x1x32xf32> to vector<8x2x32xf32>
      %c2_i32 = arith.constant 2 : i32
      %21 = arith.muli %c2_i32, %arg8 : i32
      %c0_17 = arith.constant 0 : index
      %c0_18 = arith.constant 0 : index
      %22 = arith.index_cast %21 : i32 to index
      %c0_19 = arith.constant 0 : index
      %23 = vector.load %arg7[%c0_17, %c0_18, %22, %c0_19] : memref<2x8x32x32xf32, #tpu.memory_space<vmem>>, vector<1x8x2x32xf32>
      %24 = vector.shape_cast %23 : vector<1x8x2x32xf32> to vector<8x2x32xf32>
      %25 = vector.shape_cast %20 : vector<8x2x32xf32> to vector<1x8x2x32xf32>
      tpu.vector_store %arg7[%c0_17, %c0_18, %22, %c0_19], %25 {strides = array<i32>} : memref<2x8x32x32xf32, #tpu.memory_space<vmem>>, vector<1x8x2x32xf32>,
    }
    %c16_i32_7 = arith.constant 16 : i32
    %c0_i32_8 = arith.constant 0 : i32
    %c16_i32_9 = arith.constant 16 : i32
    %5 = arith.addi %c0_i32_8, %c16_i32_9 : i32
    %c1_i32_10 = arith.constant 1 : i32
    scf.for %arg8 = %c0_i32_8 to %5 step %c1_i32_10  : i32 {
      %c1 = arith.constant 1 : index
      %c0_12 = arith.constant 0 : index
      %6 = arith.index_cast %arg8 : i32 to index
      %c0_13 = arith.constant 0 : index
      %7 = vector.load %arg2[%c1, %c0_12, %6, %c0_13] : memref<2x4x16x16xf32, #tpu.memory_space<vmem>>, vector<1x4x1x16xf32>
      %8 = vector.shape_cast %7 : vector<1x4x1x16xf32> to vector<4x1x16xf32>
      %9 = vector.shape_cast %8 : vector<4x1x16xf32> to vector<4x16xf32>
      %10 = vector.broadcast %0 : vector<4x1xf32> to vector<4x16xf32>
      %11 = arith.mulf %9, %10 : vector<4x16xf32>
      %12 = vector.broadcast %1 : vector<4x1xf32> to vector<4x16xf32>
      %13 = arith.addf %11, %12 : vector<4x16xf32>
      %cst = arith.constant 0.000000e+00 : f32
      %14 = vector.broadcast %cst : f32 to vector<4x16xf32>
      %15 = arith.maximumf %13, %14 : vector<4x16xf32>
      %cst_14 = arith.constant dense<0.000000e+00> : vector<8x16xf32>
      %16 = tpu.matmul %2, %15, %cst_14 {dimension_numbers = #tpu.dot_dimension_numbers<[1], [0], [0], [1], [0, 0, 1, 1], [], []>} : vector<8x4xf32>, vector<4x16xf32>, vector<8x16xf32> -> vector<8x16xf32>
      %cst_15 = arith.constant dense<0.000000e+00> : vector<8x32xf32>
      %17 = tpu.matmul %16, %3, %cst_15 {dimension_numbers = #tpu.dot_dimension_numbers<[1], [0], [0], [1], [0, 0, 1, 1], [], []>} : vector<8x16xf32>, vector<16x32xf32>, vector<8x32xf32> -> vector<8x32xf32>
      %18 = vector.shape_cast %17 : vector<8x32xf32> to vector<8x1x32xf32>
      %19 = vector.shape_cast %18 : vector<8x1x32xf32> to vector<8x1x32xf32>
      %20 = vector.broadcast %19 : vector<8x1x32xf32> to vector<8x2x32xf32>
      %c2_i32 = arith.constant 2 : i32
      %21 = arith.muli %c2_i32, %arg8 : i32
      %c1_16 = arith.constant 1 : index
      %c0_17 = arith.constant 0 : index
      %22 = arith.index_cast %21 : i32 to index
      %c0_18 = arith.constant 0 : index
      %23 = vector.load %arg7[%c1_16, %c0_17, %22, %c0_18] : memref<2x8x32x32xf32, #tpu.memory_space<vmem>>, vector<1x8x2x32xf32>
      %24 = vector.shape_cast %23 : vector<1x8x2x32xf32> to vector<8x2x32xf32>
      %25 = vector.shape_cast %20 : vector<8x2x32xf32> to vector<1x8x2x32xf32>
      tpu.vector_store %arg7[%c1_16, %c0_17, %22, %c0_18], %25 {strides = array<i32>} : memref<2x8x32x32xf32, #tpu.memory_space<vmem>>, vector<1x8x2x32xf32>,
    }
    %c16_i32_11 = arith.constant 16 : i32
    return
  }
  func.func @transform_0(%arg0: i32, %arg1: i32) -> (i32, i32, i32, i32) {
    %c0_i32 = arith.constant 0 : i32
    %c0_i32_0 = arith.constant 0 : i32
    %c0_i32_1 = arith.constant 0 : i32
    return %arg0, %c0_i32, %arg1, %c0_i32_0 : i32, i32, i32, i32
  }
  func.func @transform_1(%arg0: i32, %arg1: i32) -> (i32, i32) {
    %c0_i32 = arith.constant 0 : i32
    %c0_i32_0 = arith.constant 0 : i32
    %c0_i32_1 = arith.constant 0 : i32
    return %c0_i32, %c0_i32_0 : i32, i32
  }
  func.func @transform_2(%arg0: i32, %arg1: i32) -> (i32, i32) {
    %c0_i32 = arith.constant 0 : i32
    %c0_i32_0 = arith.constant 0 : i32
    %c0_i32_1 = arith.constant 0 : i32
    return %c0_i32, %c0_i32_0 : i32, i32
  }
  func.func @transform_3(%arg0: i32, %arg1: i32) -> (i32, i32) {
    %c0_i32 = arith.constant 0 : i32
    %c0_i32_0 = arith.constant 0 : i32
    %c0_i32_1 = arith.constant 0 : i32
    return %c0_i32, %c0_i32_0 : i32, i32
  }
  func.func @transform_4(%arg0: i32, %arg1: i32) -> (i32, i32) {
    %c0_i32 = arith.constant 0 : i32
    %c0_i32_0 = arith.constant 0 : i32
    %c0_i32_1 = arith.constant 0 : i32
    return %c0_i32, %c0_i32_0 : i32, i32
  }
  func.func @transform_5(%arg0: i32, %arg1: i32) -> (i32, i32, i32, i32) {
    %c0_i32 = arith.constant 0 : i32
    %c0_i32_0 = arith.constant 0 : i32
    %c0_i32_1 = arith.constant 0 : i32
    return %arg0, %c0_i32, %arg1, %c0_i32_0 : i32, i32, i32, i32
  }
}

</mosaic_0001>

<bundles_post_ra>
// kernel: tpu_custom_call.1
= control target key start
LH: loop header
LB: loop body
LE: loop exit
PB: predicated region body
PF: predicated region fallthrough
CT: control target
= control target key end

     0   :  { %10 = vsyncpa [#allocation3], 0  ;;  %s1008_s0 = inlined_call_operand.hbm [shape: f32[2,4,16,16], index: 0, kind: input, shape index: {}]   ;;  %s1009_s1 = inlined_call_operand.vmem [shape: f32[4,1], index: 1, kind: input, shape index: {}]   ;;  %s1010_s2 = inlined_call_operand.vmem [shape: f32[4,1], index: 2, kind: input, shape index: {}]   ;;  %s1011_s3 = inlined_call_operand.vmem [shape: f32[8,4], index: 3, kind: input, shape index: {}]   ;;  %s1012_s4 = inlined_call_operand.vmem [shape: f32[16,32], index: 4, kind: input, shape index: {}]   ;;  %s1013_s5 = inlined_call_operand.hbm [shape: f32[2,8,32,32], index: 5, kind: output, shape index: {}]  }
   0x1   :  { %11 = vsyncpa [#allocation4], 0  ;;  %s840_s18 = smov [#allocation2]  }
   0x2   :  { %s17_s19 = sshll.u32 %s840_s18, 4  ;;  %s18_s19 = int_to_ptr.vmem [resolvable:$true] %s17_s19 }
   0x3   :  { %s788_s20 = scalar_lea.vmem %s18_s19, 2048  ;;  %p793_p1 = scmp.lt.s32.totalorder %s18_s19, %s18_s19 }
   0x4   :  { %p789_p0 = scmp.ne.s32.totalorder %s18_s19, %s788_s20  ;;  %p794_p2 = scmp.lt.s32.totalorder %s788_s20, %s788_s20 }
   0x6   :  { %p795_p3 = por %p794_p2, %p793_p1 }
   0x8   :  { %p796_p4 = pnand %p795_p3, %p789_p0 }
   0xa   :  { %799 = shalt.err (!%p796_p4)
}
   0xb   :  { %s841_s21 = smov 128   ;;  %s842_s22 = smov 8  }
   0xc   :  { %23 = dma.hbm_to_vmem [thread:$0]  %s1008_s0, 2048, %s18_s19, [#allocation3], %s841_s21, %s841_s21, %s842_s22  }
   0xd   :  { %828 = dma.done.wait [#allocation3], 2048  }
   0xe   :  { %829 = vsyncadd [#allocation3], 4294965248  ;;  %v890_v0 = vld [vmem:[%s1009_s1] sm:$0xf]  ;;  %v910_v4 = vld [vmem:[%s1012_s4 + $0x8] sm:$0xff]  ;;  %s912_s1 = smov 0  }
   0xf   :  { %v895_v1 = vld [vmem:[%s1010_s2] sm:$0xf] }
  0x10   :  { %v900_v2 = vld [vmem:[%s1011_s3] sm:$0xff] }
  0x11   :  { %v905_v3 = vld [vmem:[%s1012_s4] sm:$0xff] }
  0x12 LB: > { %v843_v5 = vmov 0   ;;  %v844_v6 = vmov 0.0   ;;  %vm845_vm0 = vmmov 0   ;;  %s46_s2 = scalar_lea.vmem [#allocation2], %s834_s1  ;;  %vm90_vm1 = vcmask 1041409   ;;  %s700_s3 = sshll.u32 %s834_s1, 1  ;;  %s834_s1 = sphi %s912_s1, %s45_s1  }
  0x13   : > { %778 = vset.pattern.permute.xlu0 %v843_v5  ;;  %727 = vmatprep.subr.mxu0 %v844_v6  ;;  %v47_v8 = vld [vmem:[%s46_s2] sm:$0x1]  ;;  %v48_v9 = vld [vmem:[%s46_s2 + $0x10] sm:$0x1]  ;;  %vm93_vm2 = vcmask 1042434   ;;  %vm96_vm3 = vcmask 1043459   ;;  %v255_v41 = vlaneseq }
  0x14   : > { %53 = vperm.xlu0 %778, %v890_v0   ;;  %732 = vmatprep.subr.mxu1 %v844_v6  ;;  %v49_v13 = vld [vmem:[%s46_s2 + $0x20] sm:$0x1]  ;;  %v50_v14 = vld [vmem:[%s46_s2 + $0x30] sm:$0x1]  ;;  %vm102_vm4 = vcmask 1043456   ;;  %vm98_vm5 = vcmask 31744  }
  0x15   : > { %733 = vmatpush3.msra.mxu1 %v910_v4  ;;  %729 = vmatprep.mubr.msk.f32.mxu0 %vm845_vm0, %v844_v6  ;;  %vm175_vm6 = vcmask 130048   ;;  %v846_v39 = vmov 1966171168   ;;  %v256_v43 = vshrl.u32 %v255_v41, 7  ;;  %vm341_vm7 = vcmask 254976   ;;  %s340_s4 = scalar_lea.vmem [#allocation5], %s700_s3 }
  0x16   : > { %734 = vmatprep.subr.mxu1 %v844_v6  ;;  %736 = vmatprep.mubr.msk.f32.mxu1 %vm845_vm0, %v844_v6  ;;  %v253_v40 = vunpack.c.l.s4 %v846_v39  ;;  %s45_s1 = sadd.s32 1, %s834_s1  }
  0x17   : > { %735 = vmatpush3.msra.mxu1 %v905_v3  ;;  %v933_v48 = vsub.s32 0, %v256_v43  ;;  %p42_p5 = scmp.ge.s32.totalorder %s45_s1, 16  }
  0x18   : > { %68 = vperm.xlu0 %778, %v895_v1   ;;  %v254_v42 = vunpack.c.0.s8 %v253_v40  ;;  %s959_s9 = smov (%p42_p5), 0  }
  0x1a   : > { %v929_v44 = vsub.s32 %v254_v42, %v256_v43 }
  0x8f   : > { %v54_v7 = vpop.permute.xlu0 %53 }
  0x90   : > { %v55_v10 = vrot.slane %v54_v7, 1  ;;  %v56_v11 = vrot.slane %v54_v7, 2  ;;  %v57_v12 = vrot.slane %v54_v7, 3  ;;  %v62_v16 = vmul.f32 %v54_v7, %v47_v8 }
  0x92   : > { %v63_v17 = vmul.f32 %v55_v10, %v48_v9  ;;  %v64_v18 = vmul.f32 %v56_v11, %v49_v13  ;;  %v65_v19 = vmul.f32 %v57_v12, %v50_v14 }
  0x93   : > { %v69_v15 = vpop.permute.xlu0 %68 }
  0x94   : > { %v70_v20 = vrot.slane %v69_v15, 1  ;;  %v71_v21 = vrot.slane %v69_v15, 2  ;;  %v72_v22 = vrot.slane %v69_v15, 3  ;;  %v77_v23 = vadd.f32 %v69_v15, %v62_v16 }
  0x96   : > { %v78_v24 = vadd.f32 %v70_v20, %v63_v17  ;;  %v79_v25 = vadd.f32 %v71_v21, %v64_v18  ;;  %v80_v26 = vadd.f32 %v72_v22, %v65_v19  ;;  %v81_v30 = vmax.f32 %v77_v23, 0.0 }
  0x98   : > { %v82_v27 = vmax.f32 %v78_v24, 0.0  ;;  %v83_v28 = vmax.f32 %v79_v25, 0.0  ;;  %v84_v29 = vmax.f32 %v80_v26, 0.0 }
  0x9a   : > { %v89_v31 = vrot.slane %v82_v27, 7  ;;  %v92_v32 = vrot.slane %v83_v28, 6  ;;  %v95_v34 = vrot.slane %v84_v29, 5 }
  0x9c   : > { %v91_v33 = vsel %vm90_vm1, %v89_v31, %v81_v30 }
  0x9d   : > { %v94_v35 = vsel %vm93_vm2, %v92_v32, %v91_v33 }
  0x9e   : > { %v97_v36 = vsel %vm96_vm3, %v95_v34, %v94_v35 }
  0x9f   : > { %728 = vmatpush3.msk.msra.mxu0 %vm102_vm4, %v97_v36 }
  0xa0   : > { %730 = vmatmul.mubr.msk.f32.vlgmr.msra.gmra.mxu0 %vm98_vm5, %v900_v2 }
 0x160   : > { %v171_v37 = vpop.f32.mrf.mxu0 }
 0x161   : > { %737 = vmatmul.mubr.msk.f32.vlgmr.msra.gmra.mxu1 %vm175_vm6, %v171_v37 }
 0x162   : > { %v731_v38 = vpop.f32.mrf.mxu0 }
 0x221   : > { %v245_v45 = vpop.f32.mrf.mxu1 }
 0x222   : > { %v251_v46 = vcombine.high %v245_v45, %v245_v45  ;;  %v258_v47 = vrot.slane %v245_v45, %v929_v44 }
 0x223   : > { %v738_v49 = vpop.f32.mrf.mxu1 }
 0x224   : > { %v265_v50 = vrot.slane %v251_v46, %v929_v44  ;;  %v266_v51 = vcombine.high %v258_v47, %v258_v47  ;;  %v274_v52 = vrot.slane %v258_v47, %v929_v44 }
 0x226   : > { %v267_v53 = vcombine.high %v265_v50, %v265_v50  ;;  %v281_v54 = vrot.slane %v265_v50, %v929_v44  ;;  %v288_v55 = vrot.slane %v266_v51, %v929_v44  ;;  %v296_v56 = vcombine.high %v274_v52, %v274_v52 }
 0x227   : > { %v303_v57 = vrot.slane %v274_v52, %v933_v48 }
 0x228   : > { %v295_v58 = vrot.slane %v267_v53, %v929_v44  ;;  %v297_v59 = vcombine.high %v281_v54, %v281_v54  ;;  %v298_v60 = vcombine.high %v288_v55, %v288_v55  ;;  %v307_v61 = vrot.slane %v288_v55, %v933_v48 }
 0x229   : > { %v311_v62 = vrot.slane %v296_v56, %v933_v48  ;;  %v319_v63 = vrot.slane %v281_v54, %v933_v48  ;;  %342 = vst.msk [vmem:[%s340_s4] sm:$0x3] %vm341_vm7, %v303_v57 }
 0x22a   : > { %v299_v5 = vcombine.high %v295_v58, %v295_v58  ;;  %v315_v6 = vrot.slane %v298_v60, %v933_v48  ;;  %v323_v7 = vrot.slane %v295_v58, %v933_v48  ;;  %v327_v8 = vrot.slane %v297_v59, %v933_v48  ;;  %343 = vst.msk [vmem:[%s340_s4 + $0x20] sm:$0x3] %vm341_vm7, %v307_v61  ;;  %44 = sbr.rel (!%p42_p5) target bundleno = 18 (0x12), region = 62 }
 0x22b   : > { %344 = vst.msk [vmem:[%s340_s4 + $0x40] sm:$0x3] %vm341_vm7, %v311_v62  ;;  %346 = vst.msk [vmem:[%s340_s4 + $0x80] sm:$0x3] %vm341_vm7, %v319_v63 }
 0x22c   : > { %v331_v9 = vrot.slane %v299_v5, %v933_v48  ;;  %345 = vst.msk [vmem:[%s340_s4 + $0x60] sm:$0x3] %vm341_vm7, %v315_v6  ;;  %347 = vst.msk [vmem:[%s340_s4 + $0xa0] sm:$0x3] %vm341_vm7, %v323_v7 }
 0x22d   : > { %348 = vst.msk [vmem:[%s340_s4 + $0xc0] sm:$0x3] %vm341_vm7, %v327_v8 }
 0x22e   : > { %349 = vst.msk [vmem:[%s340_s4 + $0xe0] sm:$0x3] %vm341_vm7, %v331_v9 }
 0x22f LB: > { %v847_v10 = vmov 0   ;;  %v848_v11 = vmov 0.0   ;;  %vm849_vm8 = vmmov 0   ;;  %s682_s10 = scalar_lea.vmem [#allocation2], %s838_s9  ;;  %s708_s11 = sshll.u32 %s838_s9, 1  ;;  %s838_s9 = sphi %s959_s9, %s355_s9  }
 0x230   : > { %779 = vset.pattern.permute.xlu0 %v847_v10  ;;  %739 = vmatprep.subr.mxu0 %v848_v11  ;;  %v701_v13 = vld [vmem:[%s682_s10 + $0x40] sm:$0x1]  ;;  %v702_v14 = vld [vmem:[%s682_s10 + $0x50] sm:$0x1]  ;;  %s685_s12 = scalar_lea.vmem [#allocation5], %s708_s11  ;;  %s355_s9 = sadd.s32 1, %s838_s9  }
 0x231   : > { %364 = vperm.xlu0 %779, %v890_v0   ;;  %744 = vmatprep.subr.mxu1 %v848_v11  ;;  %v703_v18 = vld [vmem:[%s682_s10 + $0x60] sm:$0x1]  ;;  %v704_v19 = vld [vmem:[%s682_s10 + $0x70] sm:$0x1]  ;;  %p352_p6 = scmp.ge.s32.totalorder %s355_s9, 16  }
 0x232   : > { %745 = vmatpush3.msra.mxu1 %v910_v4  ;;  %741 = vmatprep.mubr.msk.f32.mxu0 %vm849_vm8, %v848_v11  ;;  %s850_s13 = smov (%p352_p6), [#allocation5]  }
 0x233   : > { %746 = vmatprep.subr.mxu1 %v848_v11  ;;  %748 = vmatprep.mubr.msk.f32.mxu1 %vm849_vm8, %v848_v11  ;;  %s667_s14 = sshll.u32 (%p352_p6), %s850_s13, 4  ;;  %s668_s14 = int_to_ptr.vmem [resolvable:$true] %s667_s14 }
 0x234   : > { %747 = vmatpush3.msra.mxu1 %v905_v3  ;;  %s800_s15 = scalar_lea.vmem (%p352_p6), %s668_s14, 8192  ;;  %p805_p8 = scmp.lt.s32.totalorder (%p352_p6), %s668_s14, %s668_s14 }
 0x235   : > { %379 = vperm.xlu0 %779, %v895_v1   ;;  %p801_p7 = scmp.ne.s32.totalorder (%p352_p6), %s668_s14, %s800_s15  ;;  %p806_p9 = scmp.lt.s32.totalorder (%p352_p6), %s800_s15, %s800_s15 }
 0x237   :  { %p807_p10 = por (%p352_p6), %p806_p9, %p805_p8 }
 0x239   :  { %p808_p11 = pnand (%p352_p6), %p807_p10, %p801_p7 }
 0x2ac   : > { %v365_v12 = vpop.permute.xlu0 %364 }
 0x2ad   : > { %v366_v15 = vrot.slane %v365_v12, 1  ;;  %v367_v16 = vrot.slane %v365_v12, 2  ;;  %v368_v17 = vrot.slane %v365_v12, 3  ;;  %v373_v21 = vmul.f32 %v701_v13, %v365_v12 }
 0x2af   : > { %v374_v22 = vmul.f32 %v702_v14, %v366_v15  ;;  %v375_v23 = vmul.f32 %v703_v18, %v367_v16  ;;  %v376_v27 = vmul.f32 %v704_v19, %v368_v17 }
 0x2b0   : > { %v380_v20 = vpop.permute.xlu0 %379 }
 0x2b1   : > { %v381_v24 = vrot.slane %v380_v20, 1  ;;  %v382_v25 = vrot.slane %v380_v20, 2  ;;  %v383_v26 = vrot.slane %v380_v20, 3  ;;  %v388_v28 = vadd.f32 %v380_v20, %v373_v21 }
 0x2b3   : > { %v389_v29 = vadd.f32 %v381_v24, %v374_v22  ;;  %v390_v30 = vadd.f32 %v382_v25, %v375_v23  ;;  %v391_v31 = vadd.f32 %v383_v26, %v376_v27  ;;  %v392_v35 = vmax.f32 %v388_v28, 0.0 }
 0x2b5   : > { %v393_v32 = vmax.f32 %v389_v29, 0.0  ;;  %v394_v33 = vmax.f32 %v390_v30, 0.0  ;;  %v395_v34 = vmax.f32 %v391_v31, 0.0 }
 0x2b7   : > { %v400_v36 = vrot.slane %v393_v32, 7  ;;  %v403_v37 = vrot.slane %v394_v33, 6  ;;  %v406_v39 = vrot.slane %v395_v34, 5 }
 0x2b9   : > { %v402_v38 = vsel %vm90_vm1, %v400_v36, %v392_v35 }
 0x2ba   : > { %v405_v40 = vsel %vm93_vm2, %v403_v37, %v402_v38 }
 0x2bb   : > { %v408_v41 = vsel %vm96_vm3, %v406_v39, %v405_v40 }
 0x2bc   : > { %740 = vmatpush3.msk.msra.mxu0 %vm102_vm4, %v408_v41 }
 0x2bd   : > { %742 = vmatmul.mubr.msk.f32.vlgmr.msra.gmra.mxu0 %vm98_vm5, %v900_v2 }
 0x37d   : > { %v482_v42 = vpop.f32.mrf.mxu0 }
 0x37e   : > { %749 = vmatmul.mubr.msk.f32.vlgmr.msra.gmra.mxu1 %vm175_vm6, %v482_v42 }
 0x37f   : > { %v743_v43 = vpop.f32.mrf.mxu0 }
 0x43e   : > { %v556_v45 = vpop.f32.mrf.mxu1 }
 0x43f   : > { %v562_v46 = vcombine.high %v556_v45, %v556_v45  ;;  %v569_v47 = vrot.slane %v556_v45, %v929_v44 }
 0x440   : > { %v750_v49 = vpop.f32.mrf.mxu1 }
 0x441   : > { %v576_v50 = vrot.slane %v562_v46, %v929_v44  ;;  %v577_v51 = vcombine.high %v569_v47, %v569_v47  ;;  %v585_v52 = vrot.slane %v569_v47, %v929_v44 }
 0x443   : > { %v578_v53 = vcombine.high %v576_v50, %v576_v50  ;;  %v592_v54 = vrot.slane %v576_v50, %v929_v44  ;;  %v599_v55 = vrot.slane %v577_v51, %v929_v44  ;;  %v607_v56 = vcombine.high %v585_v52, %v585_v52 }
 0x444   : > { %v614_v57 = vrot.slane %v585_v52, %v933_v48 }
 0x445   : > { %v606_v58 = vrot.slane %v578_v53, %v929_v44  ;;  %v608_v59 = vcombine.high %v592_v54, %v592_v54  ;;  %v609_v60 = vcombine.high %v599_v55, %v599_v55  ;;  %v618_v61 = vrot.slane %v599_v55, %v933_v48 }
 0x446   : > { %v622_v62 = vrot.slane %v607_v56, %v933_v48  ;;  %v630_v63 = vrot.slane %v592_v54, %v933_v48  ;;  %709 = vst.msk [vmem:[%s685_s12 + $0x100] sm:$0x3] %vm341_vm7, %v614_v57 }
 0x447   : > { %v610_v5 = vcombine.high %v606_v58, %v606_v58  ;;  %v626_v6 = vrot.slane %v609_v60, %v933_v48  ;;  %v634_v7 = vrot.slane %v606_v58, %v933_v48  ;;  %v638_v8 = vrot.slane %v608_v59, %v933_v48  ;;  %710 = vst.msk [vmem:[%s685_s12 + $0x120] sm:$0x3] %vm341_vm7, %v618_v61  ;;  %354 = sbr.rel (!%p352_p6) target bundleno = 559 (0x22f), region = 73 }
 0x448   : > { %711 = vst.msk [vmem:[%s685_s12 + $0x140] sm:$0x3] %vm341_vm7, %v622_v62  ;;  %713 = vst.msk [vmem:[%s685_s12 + $0x180] sm:$0x3] %vm341_vm7, %v630_v63 }
 0x449   : > { %v642_v9 = vrot.slane %v610_v5, %v933_v48  ;;  %712 = vst.msk [vmem:[%s685_s12 + $0x160] sm:$0x3] %vm341_vm7, %v626_v6  ;;  %714 = vst.msk [vmem:[%s685_s12 + $0x1a0] sm:$0x3] %vm341_vm7, %v634_v7 }
 0x44a   : > { %715 = vst.msk [vmem:[%s685_s12 + $0x1c0] sm:$0x3] %vm341_vm7, %v638_v8 }
 0x44b   : > { %716 = vst.msk [vmem:[%s685_s12 + $0x1e0] sm:$0x3] %vm341_vm7, %v642_v9 }
 0x44c   :  { %811 = shalt.err (!%p808_p11)
}
 0x44d   :  { %673 = dma.vmem_to_hbm [thread:$0]  %s668_s14, 8192, %s1013_s5, [#allocation4], %s841_s21, %s841_s21, %s842_s22  }
 0x44e   :  { %830 = dma.done.wait [#allocation4], 8192  }
 0x44f   :  { %831 = vsyncadd [#allocation4], 4294959104 }
 0x450   :  { %677 = vsyncpa [#allocation3], 1 }
 0x451   :  { %678 = vsyncpa [#allocation4], 1 }

</bundles_post_ra>
